<compile_context>
chip_gen: v7x
topology: tpu7x:2x2x1
jax: 0.10.0
libtpu: 0.0.40
codegen_flags: <defaults>
</compile_context>

<pallas_src>
import jax
import jax.numpy as jnp
from jax.experimental import pallas as pl
from jax.experimental.pallas import tpu as pltpu

_LANE = 128


def _round_up(n, m):
    return ((n + m - 1) // m) * m


def _mlp_kernel(x_ref, w1_ref, w23_ref, b_ref, o_ref):
    """Fused 3-layer MLP on one (TB, in_dim) batch tile; all weights VMEM-resident."""
    x = x_ref[...]                                          # (TB, IN)   compute dtype
    w2 = w23_ref[0]                                         # (P, P)
    w3 = w23_ref[1]                                         # (P, P)

    h1 = jnp.dot(x, w1_ref[...], preferred_element_type=jnp.float32)
    h1 = jnp.maximum(h1 + b_ref[0:1, :], 0.0)               # relu on f32 accumulator

    h2 = jnp.dot(h1.astype(w2.dtype), w2, preferred_element_type=jnp.float32)
    h2 = jnp.maximum(h2 + b_ref[1:2, :], 0.0)               # relu on f32 accumulator

    logits = jnp.dot(h2.astype(w3.dtype), w3,
                     preferred_element_type=jnp.float32) + b_ref[2:3, :]
    o_ref[...] = jax.nn.sigmoid(logits)                     # (TB, 128) lane-dense store


def pack_params(params, compute_dtype=jnp.bfloat16):
    """Zero-pad hidden/output widths to a lane-dense 128 multiple and collapse the
    six parameter tensors into three slabs: w1 (IN,P), w23 (2,P,P), bias (3,P)."""
    w1, b1, w2, b2, w3, b3 = (params[k] for k in ("w1", "b1", "w2", "b2", "w3", "b3"))
    in_dim, hidden = w1.shape
    out_dim = w3.shape[1]
    p = max(_round_up(hidden, _LANE), _round_up(out_dim, _LANE))

    def pad2(a, rows, cols):
        return jnp.pad(a, ((0, rows - a.shape[0]), (0, cols - a.shape[1])))

    w1_p = pad2(w1, in_dim, p).astype(compute_dtype)                         # (IN, P)
    w23 = jnp.stack([pad2(w2, p, p), pad2(w3, p, p)]).astype(compute_dtype)  # (2, P, P)
    bias = jnp.concatenate(
        [pad2(b1, 1, p), pad2(b2, 1, p), pad2(b3, 1, p)], axis=0
    ).astype(jnp.float32)                                                    # (3, P)

    return {"w1": w1_p, "w23": w23, "bias": bias,
            "in_dim": in_dim, "out_dim": out_dim, "padded": p,
            "compute_dtype": compute_dtype}


def lotto_net_forward(x, packed, *, block_b=1024):
    """x: (B, in_dim) f32. packed: output of pack_params. Returns (B, out_dim) f32."""
    in_dim, out_dim, p = packed["in_dim"], packed["out_dim"], packed["padded"]
    w1, w23, bias = packed["w1"], packed["w23"], packed["bias"]
    assert x.shape[1] == in_dim

    B = x.shape[0]
    tb = min(block_b, _round_up(B, 8))        # sublane-aligned batch tile
    b_pad = _round_up(B, tb)
    if b_pad != B:
        x = jnp.pad(x, ((0, b_pad - B), (0, 0)))
    x = x.astype(packed["compute_dtype"])

    out = pl.pallas_call(
        _mlp_kernel,
        out_shape=jax.ShapeDtypeStruct((b_pad, p), jnp.float32),
        grid_spec=pltpu.PrefetchScalarGridSpec(
            num_scalar_prefetch=0,
            grid=(b_pad // tb,),
            in_specs=[
                pl.BlockSpec((tb, in_dim), lambda i: (i, 0)),   # batch-tiled input
                pl.BlockSpec((in_dim, p), lambda i: (0, 0)),    # resident weight
                pl.BlockSpec((2, p, p), lambda i: (0, 0, 0)),   # resident w2/w3 slab
                pl.BlockSpec((3, p), lambda i: (0, 0)),         # resident bias slab
            ],
            out_specs=pl.BlockSpec((tb, p), lambda i: (i, 0)),  # lane-dense output
        ),
        compiler_params=pltpu.CompilerParams(
            dimension_semantics=("parallel",)),                 # v7x: 2 TCs on batch
    )(x, w1, w23, bias)

    return out[:B, :out_dim]


def init_params(key, input_dim=45, hidden_dim=64, output_dim=45):
    """Deterministic init mirroring torch.nn.Linear (uniform ±1/sqrt(fan_in)).
    Weights stored as (in_dim, out_dim); biases as (1, out_dim)."""
    def linear(k, fan_in, fan_out):
        kw, kb = jax.random.split(k)
        bound = 1.0 / jnp.sqrt(fan_in)
        w = jax.random.uniform(kw, (fan_in, fan_out), jnp.float32, -bound, bound)
        b = jax.random.uniform(kb, (1, fan_out), jnp.float32, -bound, bound)
        return w, b

    k1, k2, k3 = jax.random.split(key, 3)
    w1, b1 = linear(k1, input_dim, hidden_dim)
    w2, b2 = linear(k2, hidden_dim, hidden_dim)
    w3, b3 = linear(k3, hidden_dim, output_dim)
    return {"w1": w1, "b1": b1, "w2": w2, "b2": b2, "w3": w3, "b3": b3}


def _reference(x, p):
    h1 = jnp.maximum(x @ p["w1"] + p["b1"], 0.0)
    h2 = jnp.maximum(h1 @ p["w2"] + p["b2"], 0.0)
    return jax.nn.sigmoid(h2 @ p["w3"] + p["b3"])


if __name__ == "__main__":
    key = jax.random.PRNGKey(0)
    k_params, k_x = jax.random.split(key)

    input_dim, hidden_dim, output_dim = 45, 64, 45
    batch = 300  # not a multiple of 8 -> exercises batch padding; >128 -> multi-step grid

    params = init_params(k_params, input_dim, hidden_dim, output_dim)
    packed = pack_params(params)          # one-time: pad to 128 lanes, cast to bf16
    x = jax.random.normal(k_x, (batch, input_dim), jnp.float32)

    out = lotto_net_forward(x, packed, block_b=128)  # small tile so the test runs 3 grid steps
    out = jax.block_until_ready(out)

    ref = _reference(x, params)
    assert out.shape == (batch, output_dim)
    # bf16 operands with f32 accumulation vs a pure-f32 reference
    assert jnp.allclose(out, ref, atol=2e-2, rtol=2e-2)

    print("KERNEL_OK")
</pallas_src>

<mosaic_0001>
module attributes {stable_mosaic.version = 11 : i64} {
  func.func @_mlp_kernel(%arg0: i32, %arg1: memref<128x45xbf16, #tpu.memory_space<vmem>>, %arg2: memref<45x128xbf16, #tpu.memory_space<vmem>>, %arg3: memref<2x128x128xbf16, #tpu.memory_space<vmem>>, %arg4: memref<3x128xf32, #tpu.memory_space<vmem>>, %arg5: memref<128x128xf32, #tpu.memory_space<vmem>>) attributes {dimension_semantics = [#tpu.dimension_semantics<parallel>], iteration_bounds = array<i64: 3>, scalar_prefetch = 0 : i64, scratch_operands = 0 : i64, tpu.core_type = #tpu.core_type<tc>, window_params = [{transform_indices = @transform_0, window_bounds = array<i64: 128, 45>}, {pipeline_mode = #tpu.pipeline_mode<synchronous>, transform_indices = @transform_1, window_bounds = array<i64: 45, 128>}, {pipeline_mode = #tpu.pipeline_mode<synchronous>, transform_indices = @transform_2, window_bounds = array<i64: 2, 128, 128>}, {pipeline_mode = #tpu.pipeline_mode<synchronous>, transform_indices = @transform_3, window_bounds = array<i64: 3, 128>}, {transform_indices = @transform_4, window_bounds = array<i64: 128, 128>}]} {
    %c0 = arith.constant 0 : index
    %c0_0 = arith.constant 0 : index
    %0 = vector.load %arg1[%c0, %c0_0] : memref<128x45xbf16, #tpu.memory_space<vmem>>, vector<128x45xbf16>
    %c0_1 = arith.constant 0 : index
    %c0_2 = arith.constant 0 : index
    %c0_3 = arith.constant 0 : index
    %1 = vector.load %arg3[%c0_1, %c0_2, %c0_3] : memref<2x128x128xbf16, #tpu.memory_space<vmem>>, vector<1x128x128xbf16>
    %2 = vector.shape_cast %1 : vector<1x128x128xbf16> to vector<128x128xbf16>
    %c1 = arith.constant 1 : index
    %c0_4 = arith.constant 0 : index
    %c0_5 = arith.constant 0 : index
    %3 = vector.load %arg3[%c1, %c0_4, %c0_5] : memref<2x128x128xbf16, #tpu.memory_space<vmem>>, vector<1x128x128xbf16>
    %4 = vector.shape_cast %3 : vector<1x128x128xbf16> to vector<128x128xbf16>
    %c0_6 = arith.constant 0 : index
    %c0_7 = arith.constant 0 : index
    %5 = vector.load %arg2[%c0_6, %c0_7] : memref<45x128xbf16, #tpu.memory_space<vmem>>, vector<45x128xbf16>
    %cst = arith.constant dense<0.000000e+00> : vector<128x128xf32>
    %6 = tpu.matmul %0, %5, %cst {dimension_numbers = #tpu.dot_dimension_numbers<[1], [0], [0], [1], [0, 0, 1, 1], [], []>} : vector<128x45xbf16>, vector<45x128xbf16>, vector<128x128xf32> -> vector<128x128xf32>
    %c0_8 = arith.constant 0 : index
    %c0_9 = arith.constant 0 : index
    %7 = vector.load %arg4[%c0_8, %c0_9] : memref<3x128xf32, #tpu.memory_space<vmem>>, vector<1x128xf32>
    %8 = vector.broadcast %7 : vector<1x128xf32> to vector<128x128xf32>
    %9 = arith.addf %6, %8 : vector<128x128xf32>
    %cst_10 = arith.constant 0.000000e+00 : f32
    %10 = vector.broadcast %cst_10 : f32 to vector<128x128xf32>
    %11 = arith.maximumf %9, %10 : vector<128x128xf32>
    %12 = arith.truncf %11 : vector<128x128xf32> to vector<128x128xbf16>
    %cst_11 = arith.constant dense<0.000000e+00> : vector<128x128xf32>
    %13 = tpu.matmul %12, %2, %cst_11 {dimension_numbers = #tpu.dot_dimension_numbers<[1], [0], [0], [1], [0, 0, 1, 1], [], []>} : vector<128x128xbf16>, vector<128x128xbf16>, vector<128x128xf32> -> vector<128x128xf32>
    %c1_12 = arith.constant 1 : index
    %c0_13 = arith.constant 0 : index
    %14 = vector.load %arg4[%c1_12, %c0_13] : memref<3x128xf32, #tpu.memory_space<vmem>>, vector<1x128xf32>
    %15 = vector.broadcast %14 : vector<1x128xf32> to vector<128x128xf32>
    %16 = arith.addf %13, %15 : vector<128x128xf32>
    %cst_14 = arith.constant 0.000000e+00 : f32
    %17 = vector.broadcast %cst_14 : f32 to vector<128x128xf32>
    %18 = arith.maximumf %16, %17 : vector<128x128xf32>
    %19 = arith.truncf %18 : vector<128x128xf32> to vector<128x128xbf16>
    %cst_15 = arith.constant dense<0.000000e+00> : vector<128x128xf32>
    %20 = tpu.matmul %19, %4, %cst_15 {dimension_numbers = #tpu.dot_dimension_numbers<[1], [0], [0], [1], [0, 0, 1, 1], [], []>} : vector<128x128xbf16>, vector<128x128xbf16>, vector<128x128xf32> -> vector<128x128xf32>
    %c2 = arith.constant 2 : index
    %c0_16 = arith.constant 0 : index
    %21 = vector.load %arg4[%c2, %c0_16] : memref<3x128xf32, #tpu.memory_space<vmem>>, vector<1x128xf32>
    %22 = vector.broadcast %21 : vector<1x128xf32> to vector<128x128xf32>
    %23 = arith.addf %20, %22 : vector<128x128xf32>
    %24 = arith.negf %23 : vector<128x128xf32>
    %25 = math.exp %24 : vector<128x128xf32>
    %cst_17 = arith.constant 1.000000e+00 : f32
    %26 = vector.broadcast %cst_17 : f32 to vector<128x128xf32>
    %27 = arith.addf %26, %25 : vector<128x128xf32>
    %28 = arith.divf %26, %27 : vector<128x128xf32>
    %c0_18 = arith.constant 0 : index
    %c0_19 = arith.constant 0 : index
    %29 = vector.load %arg5[%c0_18, %c0_19] : memref<128x128xf32, #tpu.memory_space<vmem>>, vector<128x128xf32>
    tpu.vector_store %arg5[%c0_18, %c0_19], %28 {strides = array<i32>} : memref<128x128xf32, #tpu.memory_space<vmem>>, vector<128x128xf32>,
    return
  }
  func.func @transform_0(%arg0: i32) -> (i32, i32) {
    %c0_i32 = arith.constant 0 : i32
    %c0_i32_0 = arith.constant 0 : i32
    return %arg0, %c0_i32 : i32, i32
  }
  func.func @transform_1(%arg0: i32) -> (i32, i32) {
    %c0_i32 = arith.constant 0 : i32
    %c0_i32_0 = arith.constant 0 : i32
    %c0_i32_1 = arith.constant 0 : i32
    return %c0_i32, %c0_i32_0 : i32, i32
  }
  func.func @transform_2(%arg0: i32) -> (i32, i32, i32) {
    %c0_i32 = arith.constant 0 : i32
    %c0_i32_0 = arith.constant 0 : i32
    %c0_i32_1 = arith.constant 0 : i32
    %c0_i32_2 = arith.constant 0 : i32
    return %c0_i32, %c0_i32_0, %c0_i32_1 : i32, i32, i32
  }
  func.func @transform_3(%arg0: i32) -> (i32, i32) {
    %c0_i32 = arith.constant 0 : i32
    %c0_i32_0 = arith.constant 0 : i32
    %c0_i32_1 = arith.constant 0 : i32
    return %c0_i32, %c0_i32_0 : i32, i32
  }
  func.func @transform_4(%arg0: i32) -> (i32, i32) {
    %c0_i32 = arith.constant 0 : i32
    %c0_i32_0 = arith.constant 0 : i32
    return %arg0, %c0_i32 : i32, i32
  }
}

</mosaic_0001>

<bundles_post_ra>
// kernel: tpu_custom_call.1
= control target key start
LH: loop header
LB: loop body
LE: loop exit
PB: predicated region body
PF: predicated region fallthrough
CT: control target
= control target key end

     0   :  { %9 = vsyncpa [#allocation3], 0  ;;  %s1637_s0 = inlined_call_operand.vmem [shape: bf16[384,45], index: 0, kind: input, shape index: {}]   ;;  %s1638_s1 = inlined_call_operand.vmem [shape: bf16[45,128], index: 1, kind: input, shape index: {}]   ;;  %s1639_s2 = inlined_call_operand.vmem [shape: bf16[2,128,128], index: 2, kind: input, shape index: {}]   ;;  %s1640_s3 = inlined_call_operand.vmem [shape: f32[3,128], index: 3, kind: input, shape index: {}]   ;;  %s1641_s4 = inlined_call_operand.hbm [shape: f32[384,128], index: 4, kind: output, shape index: {}]  }
   0x1   :  { %11 = vsyncpa [#allocation3 + $0x1], 0  ;;  %s1420_s15 = smov 0   ;;  %s1422_s16 = smov 0  }
   0x2   :  { %s1424_s17 = smov 0   ;;  %s1426_s18 = smov 0  }
   0x3 LB: > { %s1441_s19 = sadd.s32 4294967295, %s1389_s18   ;;  %s982_s20 = sadd.s32 4294967294, %s1389_s18   ;;  %s1389_s18 = sphi %s1426_s18, %s1647_s18   ;;  %s1385_s17 = sphi %s1424_s17, %s1646_s17   ;;  %s1381_s16 = sphi %s1422_s16, %s1645_s16   ;;  %s1377_s15 = sphi %s1420_s15, %s1644_s15  }
   0x4   : > { %s1445_s21 = sadd.s32 1, %s1389_s18   ;;  %s113_s22 = sadd.s32 1, %s1385_s17 }
   0x5   : > { %s110_s23 = ssub.s32 %s1389_s18, %s1445_s21  ;;  %p123_p0 = scmp.ne.s32.totalorder %s1385_s17, %s1381_s16 }
   0x6   : > { %p111_p1 = scmp.eq.s32.totalorder %s110_s23, 0  ;;  %p124_p2 = scmp.eq.s32.totalorder %s1441_s19, 2 }
   0x7   : > { %p129_p3 = scmp.ne.s32.totalorder %s1381_s16, %s1377_s15  ;;  %p130_p4 = scmp.eq.s32.totalorder %s982_s20, 2 }
   0x8   : > { %s1456_s24 = scalar_select %p111_p1, %s1385_s17, %s113_s22  }
   0x9   : > { %p1458_p5 = por %p124_p2, %p123_p0  ;;  %p1462_p6 = por %p130_p4, %p129_p3 }
   0xa   : > { %p985_p7 = scmp.ge.s32.totalorder %s1389_s18, 1  ;;  %p166_p8 = scmp.lt.s32.totalorder %s1389_s18, 4 }
   0xc   : > { %p167_p9 = pnand %p985_p7, %p166_p8 }
   0xd   : > { %v1236_v0 = vld [vmem:[%s1638_s1] sm:$0xff] (!%p167_p9)   ;;  %vm342_vm0 = vcmask (!%p167_p9), 1045504   ;;  %v1237_v1 = vld [vmem:[%s1638_s1 + $0x8] sm:$0xff] (!%p167_p9)   ;;  %vm343_vm1 = vcmask (!%p167_p9), 1046528   ;;  %v1238_v2 = vld [vmem:[%s1638_s1 + $0x10] sm:$0x7f] (!%p167_p9)  }
   0xe   : > { %170 = sbr.rel (%p167_p9) target bundleno = 753 (0x2f1), region = 36  ;;  %1108 = vmatprep.subr.bf16.mxu0 (!%p167_p9), %v1236_v0  ;;  %s987_s7 = sshll.u32 (!%p167_p9), %s1441_s19, 4  ;;  %v1247_v3 = vld [vmem:[%s1639_s2] sm:$0xff] (!%p167_p9)   ;;  %v1391_v4 = vmov (!%p167_p9), 65535   ;;  %v1248_v7 = vld [vmem:[%s1639_s2 + $0x8] sm:$0xff] (!%p167_p9)   ;;  %v1249_v9 = vld [vmem:[%s1639_s2 + $0x10] sm:$0xff] (!%p167_p9)  }
   0xf   : > { %1109 = vmatpush3.bf16.msra.mxu0 (!%p167_p9), %v1236_v0  ;;  %v344_v5 = vsel (!%p167_p9), %vm342_vm0, 4294967295, %v1391_v4  ;;  %p193_p10 = scmp.lt.s32.totalorder (!%p167_p9), %s987_s7, 47  ;;  %1130 = vmatprep.subr.bf16.mxu1 (!%p167_p9), %v1247_v3  ;;  %vm317_vm2 = vcmask (!%p167_p9), 367616   ;;  %v1250_v10 = vld [vmem:[%s1639_s2 + $0x18] sm:$0xff] (!%p167_p9)   ;;  %v1251_v14 = vld [vmem:[%s1639_s2 + $0x20] sm:$0xff] (!%p167_p9)   ;;  %v1252_v17 = vld [vmem:[%s1639_s2 + $0x28] sm:$0xff] (!%p167_p9)  }
  0x10   : > { %1110 = vmatprep.subr.bf16.mxu0 (!%p167_p9), %v1237_v1  ;;  %v345_v6 = vsel (!%p167_p9), %vm343_vm1, %v344_v5, 0  ;;  %1131 = vmatpush3.bf16.msra.mxu1 (!%p167_p9), %v1247_v3  ;;  %v1253_v21 = vld [vmem:[%s1639_s2 + $0x30] sm:$0xff] (!%p167_p9)   ;;  %v1254_v22 = vld [vmem:[%s1639_s2 + $0x38] sm:$0xff] (!%p167_p9)   ;;  %v1255_v23 = vld [vmem:[%s1639_s2 + $0x40] sm:$0xff] (!%p167_p9)   ;;  %s189_s22 = sand.u32 (!%p167_p9), 1, %s1381_s16   ;;  %s1064_s28 = sshll.u32 (!%p167_p9), %s1441_s19, 11 }
  0x11   : > { %v347_v8 = vand.u32 (!%p167_p9), %v1238_v2, %v345_v6  ;;  %1132 = vmatprep.subr.bf16.mxu1 (!%p167_p9), %v1248_v7  ;;  %v1256_v24 = vld [vmem:[%s1639_s2 + $0x48] sm:$0xff] (!%p167_p9)   ;;  %v1257_v25 = vld [vmem:[%s1639_s2 + $0x50] sm:$0xff] (!%p167_p9)   ;;  %v1258_v26 = vld [vmem:[%s1639_s2 + $0x58] sm:$0xff] (!%p167_p9)   ;;  %s1587_s6 = scalar_lea.hbm (!%p167_p9), %s1641_s4, %s1064_s28  ;;  %s1596_s19 = scalar_lea.sflag (!%p167_p9), [#allocation3], %s189_s22 }
  0x12   : > { %v1259_v27 = vld [vmem:[%s1639_s2 + $0x60] sm:$0xff] (!%p167_p9)   ;;  %v1260_v28 = vld [vmem:[%s1639_s2 + $0x68] sm:$0xff] (!%p167_p9)   ;;  %s1392_s8 = smov (!%p167_p9), [#allocation2]  }
  0x13   : > { %1111 = vmatpush3.bf16.msra.mxu0 (!%p167_p9), %v1237_v1  ;;  %v1005_v29 = vld [vmem:[%s1640_s3] ss:$0 sm:$0xff] (!%p167_p9)  ;;  %s1331_s9 = sshll.u32 (!%p167_p9), %s1392_s8, 4  ;;  %s1332_s9 = int_to_ptr.vmem [resolvable:$false] %s1331_s9 }
  0x14   : > { %1112 = vmatprep.subr.bf16.mxu0 (!%p167_p9), %v347_v8  ;;  %1133 = vmatpush3.bf16.msra.mxu1 (!%p167_p9), %v1248_v7  ;;  %s1333_s10 = scalar_lea.vmem (!%p167_p9), %s1332_s9, 4096 }
  0x15   : > { %s1649_s7 = smov (!%p193_p10, %s987_s7), 47  ;;  %1134 = vmatprep.subr.bf16.mxu1 %v1249_v9 }
  0x16   : > { %s988_s14 = sshll.u32 %s1649_s7, 2 }
  0x17   : > { %s196_s23 = scalar_lea.vmem %s1637_s0, %s988_s14  ;;  %1113 = vmatpush3.bf16.msra.mxu0 %v347_v8 }
  0x18   : > { %v1239_v11 = vld [vmem:[%s196_s23] sm:$0xff]   ;;  %v1240_v12 = vld [vmem:[%s196_s23 + $0x8] sm:$0xff]   ;;  %v1241_v13 = vld [vmem:[%s196_s23 + $0x10] sm:$0xff]   ;;  %1135 = vmatpush3.bf16.msra.mxu1 %v1249_v9  ;;  %1162 = vmatprep.subr.bf16.mxu0 %v1255_v23 }
  0x19   : > { %1114 = vmatprep.mubr.msk.bf16.mxu0 %vm317_vm2, %v1239_v11  ;;  %1136 = vmatprep.subr.bf16.mxu1 %v1250_v10  ;;  %v1242_v15 = vld [vmem:[%s196_s23 + $0x18] sm:$0xff]   ;;  %v1243_v16 = vld [vmem:[%s196_s23 + $0x20] sm:$0xff]   ;;  %v1244_v18 = vld [vmem:[%s196_s23 + $0x28] sm:$0xff]  }
  0x1a   : > { %1115 = vmatmul.mubr.msk.bf16.vlgmr.msra.gmra.mrb[0].mxu0 %vm317_vm2, %v1240_v12  ;;  %v1245_v19 = vld [vmem:[%s196_s23 + $0x30] sm:$0xff]   ;;  %v1246_v20 = vld [vmem:[%s196_s23 + $0x38] sm:$0xff]   ;;  %s986_s23 = sshll.u32 %s189_s22, 7 }
  0x1b   : > { %1118 = vmatprep.mubr.msk.bf16.mxu0 %vm317_vm2, %v1241_v13  ;;  %1163 = vmatpush3.bf16.msra.mxu0 %v1255_v23  ;;  %v1262_v23 = vld [vmem:[%s1639_s2 + $0x78] sm:$0xff]   ;;  %s1567_s27 = scalar_lea.vmem [#allocation2], %s986_s23 }
  0x1c   : > { %1137 = vmatpush3.bf16.msra.mxu1 %v1250_v10  ;;  %1164 = vmatprep.subr.bf16.mxu0 %v1256_v24  ;;  %s920_s29 = sshll.u32 %s1567_s27, 4  ;;  %s1589_s29 = int_to_ptr.vmem [resolvable:$true] %s920_s29 }
  0x1d   : > { %1138 = vmatprep.subr.bf16.mxu1 %v1251_v14  ;;  %s1327_s7 = scalar_lea.vmem %s1589_s29, 2048  ;;  %p1334_p0 = scmp.lt.s32.totalorder %s1589_s29, %s1332_s9 }
  0x1e   : > { %p1328_p11 = scmp.ne.s32.totalorder %s1589_s29, %s1327_s7  ;;  %p1335_p1 = scmp.lt.s32.totalorder %s1333_s10, %s1327_s7 }
  0x1f   : > { %1165 = vmatpush3.bf16.msra.mxu0 %v1256_v24  ;;  %v1025_v24 = vld [vmem:[%s1640_s3 + $0x1] ss:$0 sm:$0xff] }
  0x20   : > { %1139 = vmatpush3.bf16.msra.mxu1 %v1251_v14  ;;  %1166 = vmatprep.subr.bf16.mxu0 %v1257_v25  ;;  %p1329_p12 = pnand %p1328_p11, %p1458_p5  ;;  %p1336_p2 = por %p1335_p1, %p1334_p0 }
  0x21   : > { %1140 = vmatprep.subr.bf16.mxu1 %v1252_v17 }
  0x22   : > { %1119 = vmatmul.mubr.msk.bf16.gmra.mrb[4].mxu0 %vm317_vm2, %v1242_v15  ;;  %p1330_p13 = pneg %p1329_p12 }
  0x23   : > { %1122 = vmatprep.mubr.msk.bf16.mxu0 %vm317_vm2, %v1243_v16  ;;  %1167 = vmatpush3.bf16.msra.mxu0 %v1257_v25 }
  0x24   : > { %1141 = vmatpush3.bf16.msra.mxu1 %v1252_v17  ;;  %1168 = vmatprep.subr.bf16.mxu0 %v1258_v26  ;;  %p1337_p3 = pnand %p1336_p2, %p1330_p13 }
  0x25   : > { %1142 = vmatprep.subr.bf16.mxu1 %v1253_v21 }
  0x27   : > { %1169 = vmatpush3.bf16.msra.mxu0 %v1258_v26 }
  0x28   : > { %1143 = vmatpush3.bf16.msra.mxu1 %v1253_v21  ;;  %1170 = vmatprep.subr.bf16.mxu0 %v1259_v27 }
  0x29   : > { %1144 = vmatprep.subr.bf16.mxu1 %v1254_v22 }
  0x2a   : > { %1123 = vmatmul.mubr.msk.bf16.gmra.mrb[8].mxu0 %vm317_vm2, %v1244_v18 }
  0x2b   : > { %1126 = vmatprep.mubr.msk.bf16.mxu0 %vm317_vm2, %v1245_v19  ;;  %1171 = vmatpush3.bf16.msra.mxu0 %v1259_v27 }
  0x2c   : > { %1145 = vmatpush3.bf16.msra.mxu1 %v1254_v22  ;;  %1172 = vmatprep.subr.bf16.mxu0 %v1260_v28  ;;  %v1261_v22 = vld [vmem:[%s1639_s2 + $0x70] sm:$0xff]  }
  0x2f   : > { %1173 = vmatpush3.bf16.msra.mxu0 %v1260_v28 }
  0x30   : > { %1174 = vmatprep.subr.bf16.mxu0 %v1261_v22 }
  0x32   : > { %1127 = vmatmul.mubr.msk.bf16.gmra.mrb[12].mxu0 %vm317_vm2, %v1246_v20 }
  0x33   : > { %1175 = vmatpush3.bf16.msra.mxu0 %v1261_v22 }
  0x34   : > { %1176 = vmatprep.subr.bf16.mxu0 %v1262_v23 }
  0x37   : > { %1177 = vmatpush3.bf16.msra.mxu0 %v1262_v23 }
  0xed   : > { %v1116_v30 = vpop.f32.mrb[0].mxu0 }
  0xee   : > { %v392_v31 = vadd.f32 %v1116_v30, %v1005_v29  ;;  %v383_v32 = vpop.f32.mrb[1].mxu0 }
  0xef   : > { %v384_v33 = vadd.f32 %v1005_v29, %v383_v32  ;;  %v1117_v34 = vpop.f32.mrb[2].mxu0 }
  0xf0   : > { %v395_v35 = vadd.f32 %v1117_v34, %v1005_v29  ;;  %v386_v36 = vpop.f32.mrb[3].mxu0  ;;  %v448_v38 = vmax.f32 %v392_v31, 0.0 }
  0xf1   : > { %v387_v37 = vadd.f32 %v1005_v29, %v386_v36  ;;  %v446_v40 = vmax.f32 %v384_v33, 0.0 }
  0xf2   : > { %v449_v39 = vmax.f32 %v395_v35, 0.0 }
  0xf3   : > { %v447_v41 = vmax.f32 %v387_v37, 0.0 }
  0xf4   : > { %v463_v42 = vpack.c.bf16 %v449_v39, %v448_v38 }
  0xf5   : > { %v1120_v43 = vpop.f32.mrb[4].mxu0  ;;  %v462_v44 = vpack.c.bf16 %v447_v41, %v446_v40 }
  0xf6   : > { %v408_v45 = vadd.f32 %v1120_v43, %v1005_v29  ;;  %v399_v46 = vpop.f32.mrb[5].mxu0 }
  0xf7   : > { %v400_v47 = vadd.f32 %v1005_v29, %v399_v46  ;;  %v1121_v48 = vpop.f32.mrb[6].mxu0  ;;  %1146 = vmatprep.mubr.bf16.mxu1 %v462_v44 }
  0xf8   : > { %v411_v49 = vadd.f32 %v1121_v48, %v1005_v29  ;;  %v402_v50 = vpop.f32.mrb[7].mxu0  ;;  %1147 = vmatmul.mubr.bf16.vlgmr.msra.gmra.mrb[0].mxu1 %v463_v42  ;;  %v452_v52 = vmax.f32 %v408_v45, 0.0 }
  0xf9   : > { %v403_v51 = vadd.f32 %v1005_v29, %v402_v50  ;;  %v450_v54 = vmax.f32 %v400_v47, 0.0 }
  0xfa   : > { %v453_v53 = vmax.f32 %v411_v49, 0.0 }
  0xfb   : > { %v451_v55 = vmax.f32 %v403_v51, 0.0 }
  0xfc   : > { %v465_v56 = vpack.c.bf16 %v453_v53, %v452_v52 }
  0xfd   : > { %v464_v57 = vpack.c.bf16 %v451_v55, %v450_v54  ;;  %v1124_v58 = vpop.f32.mrb[8].mxu0 }
  0xfe   : > { %v424_v59 = vadd.f32 %v1124_v58, %v1005_v29  ;;  %v415_v60 = vpop.f32.mrb[9].mxu0 }
  0xff   : > { %v416_v61 = vadd.f32 %v1005_v29, %v415_v60  ;;  %v1125_v62 = vpop.f32.mrb[10].mxu0  ;;  %1150 = vmatprep.mubr.bf16.mxu1 %v464_v57 }
 0x100   : > { %v427_v63 = vadd.f32 %v1125_v62, %v1005_v29  ;;  %v418_v0 = vpop.f32.mrb[11].mxu0  ;;  %1151 = vmatmul.mubr.bf16.gmra.mrb[4].mxu1 %v465_v56  ;;  %v456_v2 = vmax.f32 %v424_v59, 0.0 }
 0x101   : > { %v419_v1 = vadd.f32 %v1005_v29, %v418_v0  ;;  %v454_v4 = vmax.f32 %v416_v61, 0.0 }
 0x102   : > { %v457_v3 = vmax.f32 %v427_v63, 0.0 }
 0x103   : > { %v455_v5 = vmax.f32 %v419_v1, 0.0 }
 0x104   : > { %v467_v6 = vpack.c.bf16 %v457_v3, %v456_v2 }
 0x105   : > { %v466_v7 = vpack.c.bf16 %v455_v5, %v454_v4  ;;  %v1128_v8 = vpop.f32.mrb[12].mxu0 }
 0x106   : > { %v440_v9 = vadd.f32 %v1128_v8, %v1005_v29  ;;  %v431_v10 = vpop.f32.mrb[13].mxu0 }
 0x107   : > { %v432_v11 = vadd.f32 %v1005_v29, %v431_v10  ;;  %v1129_v12 = vpop.f32.mrb[14].mxu0  ;;  %1154 = vmatprep.mubr.bf16.mxu1 %v466_v7 }
 0x108   : > { %v443_v13 = vadd.f32 %v1129_v12, %v1005_v29  ;;  %v434_v14 = vpop.f32.mrb[15].mxu0  ;;  %1155 = vmatmul.mubr.bf16.gmra.mrb[8].mxu1 %v467_v6  ;;  %v460_v16 = vmax.f32 %v440_v9, 0.0 }
 0x109   : > { %v435_v15 = vadd.f32 %v1005_v29, %v434_v14  ;;  %v458_v18 = vmax.f32 %v432_v11, 0.0 }
 0x10a   : > { %v461_v17 = vmax.f32 %v443_v13, 0.0 }
 0x10b   : > { %v459_v19 = vmax.f32 %v435_v15, 0.0 }
 0x10c   : > { %v469_v20 = vpack.c.bf16 %v461_v17, %v460_v16  ;;  %v1546_v17 = vld [vmem:[%s1640_s3 + $0x2] ss:$0 sm:$0xff] }
 0x10d   : > { %v468_v21 = vpack.c.bf16 %v459_v19, %v458_v18 }
 0x10f   : > { %1158 = vmatprep.mubr.bf16.mxu1 %v468_v21 }
 0x110   : > { %1159 = vmatmul.mubr.bf16.gmra.mrb[12].mxu1 %v469_v20 }
 0x1cb   : > { %v1148_v25 = vpop.f32.mrb[0].mxu1 }
 0x1cc   : > { %v566_v26 = vadd.f32 %v1148_v25, %v1025_v24  ;;  %v557_v27 = vpop.f32.mrb[1].mxu1 }
 0x1cd   : > { %v558_v28 = vadd.f32 %v1025_v24, %v557_v27  ;;  %v1149_v29 = vpop.f32.mrb[2].mxu1 }
 0x1ce   : > { %v569_v30 = vadd.f32 %v1149_v29, %v1025_v24  ;;  %v560_v31 = vpop.f32.mrb[3].mxu1  ;;  %v622_v33 = vmax.f32 %v566_v26, 0.0 }
 0x1cf   : > { %v561_v32 = vadd.f32 %v1025_v24, %v560_v31  ;;  %v620_v35 = vmax.f32 %v558_v28, 0.0 }
 0x1d0   : > { %v623_v34 = vmax.f32 %v569_v30, 0.0 }
 0x1d1   : > { %v621_v36 = vmax.f32 %v561_v32, 0.0 }
 0x1d2   : > { %v637_v37 = vpack.c.bf16 %v623_v34, %v622_v33 }
 0x1d3   : > { %v636_v38 = vpack.c.bf16 %v621_v36, %v620_v35  ;;  %v1152_v39 = vpop.f32.mrb[4].mxu1 }
 0x1d4   : > { %v582_v40 = vadd.f32 %v1152_v39, %v1025_v24  ;;  %v573_v41 = vpop.f32.mrb[5].mxu1 }
 0x1d5   : > { %v574_v42 = vadd.f32 %v1025_v24, %v573_v41  ;;  %v1153_v43 = vpop.f32.mrb[6].mxu1  ;;  %1178 = vmatprep.mubr.bf16.mxu0 %v636_v38 }
 0x1d6   : > { %v585_v44 = vadd.f32 %v1153_v43, %v1025_v24  ;;  %v576_v45 = vpop.f32.mrb[7].mxu1  ;;  %1179 = vmatmul.mubr.bf16.vlgmr.msra.gmra.mrb[16].mxu0 %v637_v37  ;;  %v626_v47 = vmax.f32 %v582_v40, 0.0 }
 0x1d7   : > { %v577_v46 = vadd.f32 %v1025_v24, %v576_v45  ;;  %v624_v49 = vmax.f32 %v574_v42, 0.0 }
 0x1d8   : > { %v627_v48 = vmax.f32 %v585_v44, 0.0 }
 0x1d9   : > { %v625_v50 = vmax.f32 %v577_v46, 0.0 }
 0x1da   : > { %v639_v51 = vpack.c.bf16 %v627_v48, %v626_v47 }
 0x1db   : > { %v638_v52 = vpack.c.bf16 %v625_v50, %v624_v49  ;;  %v1156_v53 = vpop.f32.mrb[8].mxu1 }
 0x1dc   : > { %v598_v54 = vadd.f32 %v1156_v53, %v1025_v24  ;;  %v589_v55 = vpop.f32.mrb[9].mxu1 }
 0x1dd   : > { %v590_v56 = vadd.f32 %v1025_v24, %v589_v55  ;;  %v1157_v57 = vpop.f32.mrb[10].mxu1  ;;  %1182 = vmatprep.mubr.bf16.mxu0 %v638_v52 }
 0x1de   : > { %v601_v58 = vadd.f32 %v1157_v57, %v1025_v24  ;;  %v592_v59 = vpop.f32.mrb[11].mxu1  ;;  %1183 = vmatmul.mubr.bf16.gmra.mrb[20].mxu0 %v639_v51  ;;  %v630_v61 = vmax.f32 %v598_v54, 0.0 }
 0x1df   : > { %v593_v60 = vadd.f32 %v1025_v24, %v592_v59  ;;  %v628_v63 = vmax.f32 %v590_v56, 0.0 }
 0x1e0   : > { %v631_v62 = vmax.f32 %v601_v58, 0.0 }
 0x1e1   : > { %v629_v0 = vmax.f32 %v593_v60, 0.0 }
 0x1e2   : > { %v641_v1 = vpack.c.bf16 %v631_v62, %v630_v61 }
 0x1e3   : > { %v640_v2 = vpack.c.bf16 %v629_v0, %v628_v63  ;;  %v1160_v3 = vpop.f32.mrb[12].mxu1 }
 0x1e4   : > { %v614_v4 = vadd.f32 %v1160_v3, %v1025_v24  ;;  %v605_v5 = vpop.f32.mrb[13].mxu1 }
 0x1e5   : > { %v606_v6 = vadd.f32 %v1025_v24, %v605_v5  ;;  %v1161_v7 = vpop.f32.mrb[14].mxu1  ;;  %1186 = vmatprep.mubr.bf16.mxu0 %v640_v2 }
 0x1e6   : > { %v617_v8 = vadd.f32 %v1161_v7, %v1025_v24  ;;  %v608_v9 = vpop.f32.mrb[15].mxu1  ;;  %1187 = vmatmul.mubr.bf16.gmra.mrb[24].mxu0 %v641_v1  ;;  %v634_v11 = vmax.f32 %v614_v4, 0.0 }
 0x1e7   : > { %v609_v10 = vadd.f32 %v1025_v24, %v608_v9  ;;  %v632_v13 = vmax.f32 %v606_v6, 0.0 }
 0x1e8   : > { %v635_v12 = vmax.f32 %v617_v8, 0.0 }
 0x1e9   : > { %v633_v14 = vmax.f32 %v609_v10, 0.0 }
 0x1ea   : > { %v643_v15 = vpack.c.bf16 %v635_v12, %v634_v11 }
 0x1eb   : > { %v642_v16 = vpack.c.bf16 %v633_v14, %v632_v13 }
 0x1ed   : > { %1190 = vmatprep.mubr.bf16.mxu0 %v642_v16 }
 0x1ee   : > { %1191 = vmatmul.mubr.bf16.gmra.mrb[28].mxu0 %v643_v15 }
 0x2a9   : > { %v1180_v18 = vpop.f32.mrb[16].mxu0 }
 0x2aa   : > { %v740_v19 = vadd.f32 %v1180_v18, %v1546_v17  ;;  %v731_v20 = vpop.f32.mrb[17].mxu0 }
 0x2ab   : > { %v732_v21 = vadd.f32 %v1546_v17, %v731_v20  ;;  %v1181_v22 = vpop.f32.mrb[18].mxu0 }
 0x2ac   : > { %v1045_v23 = vmul.f32 -1.442695, %v740_v19  ;;  %v743_v24 = vadd.f32 %v1181_v22, %v1546_v17  ;;  %v734_v25 = vpop.f32.mrb[19].mxu0 }
 0x2ad   : > { %v1043_v26 = vmul.f32 -1.442695, %v732_v21  ;;  %v735_v27 = vadd.f32 %v1546_v17, %v734_v25 }
 0x2ae   : > { %1263 = vpow2.f32 %v1045_v23  ;;  %v1046_v28 = vmul.f32 -1.442695, %v743_v24 }
 0x2af   : > { %1265 = vpow2.f32 %v1043_v26  ;;  %v1044_v29 = vmul.f32 -1.442695, %v735_v27 }
 0x2b0   : > { %1267 = vpow2.f32 %v1046_v28 }
 0x2b1   : > { %1269 = vpow2.f32 %v1044_v29  ;;  %v1184_v30 = vpop.f32.mrb[20].mxu0 }
 0x2b2   : > { %v756_v31 = vadd.f32 %v1184_v30, %v1546_v17  ;;  %v747_v32 = vpop.f32.mrb[21].mxu0 }
 0x2b3   : > { %v748_v33 = vadd.f32 %v1546_v17, %v747_v32  ;;  %v1185_v34 = vpop.f32.mrb[22].mxu0 }
 0x2b4   : > { %v1049_v35 = vmul.f32 -1.442695, %v756_v31  ;;  %v759_v36 = vadd.f32 %v1185_v34, %v1546_v17  ;;  %v750_v37 = vpop.f32.mrb[23].mxu0 }
 0x2b5   : > { %v1047_v38 = vmul.f32 -1.442695, %v748_v33  ;;  %v751_v39 = vadd.f32 %v1546_v17, %v750_v37 }
 0x2b6   : > { %1271 = vpow2.f32 %v1049_v35  ;;  %v1050_v40 = vmul.f32 -1.442695, %v759_v36 }
 0x2b7   : > { %1273 = vpow2.f32 %v1047_v38  ;;  %v1048_v41 = vmul.f32 -1.442695, %v751_v39 }
 0x2b8   : > { %v1264_v42 = vpop.eup %1263  ;;  %1275 = vpow2.f32 %v1050_v40 }
 0x2b9   : > { %v1266_v43 = vpop.eup %1265  ;;  %v844_v44 = vadd.f32 1.0, %v1264_v42  ;;  %1277 = vpow2.f32 %v1048_v41  ;;  %v1188_v45 = vpop.f32.mrb[24].mxu0 }
 0x2ba   : > { %v1268_v46 = vpop.eup %1267  ;;  %v842_v47 = vadd.f32 1.0, %v1266_v43  ;;  %v772_v48 = vadd.f32 %v1188_v45, %v1546_v17  ;;  %v763_v49 = vpop.f32.mrb[25].mxu0 }
 0x2bb   : > { %v1270_v50 = vpop.eup %1269  ;;  %1279 = vrcp.f32 %v844_v44  ;;  %v845_v51 = vadd.f32 1.0, %v1268_v46  ;;  %v764_v52 = vadd.f32 %v1546_v17, %v763_v49  ;;  %v1189_v53 = vpop.f32.mrb[26].mxu0 }
 0x2bc   : > { %1281 = vrcp.f32 %v842_v47  ;;  %v843_v54 = vadd.f32 1.0, %v1270_v50  ;;  %v1053_v55 = vmul.f32 -1.442695, %v772_v48  ;;  %v775_v56 = vadd.f32 %v1189_v53, %v1546_v17  ;;  %v766_v57 = vpop.f32.mrb[27].mxu0 }
 0x2bd   : > { %1283 = vrcp.f32 %v845_v51  ;;  %v1051_v58 = vmul.f32 -1.442695, %v764_v52  ;;  %v767_v59 = vadd.f32 %v1546_v17, %v766_v57 }
 0x2be   : > { %1285 = vrcp.f32 %v843_v54  ;;  %v1054_v60 = vmul.f32 -1.442695, %v775_v56 }
 0x2bf   : > { %1287 = vpow2.f32 %v1053_v55  ;;  %v1052_v61 = vmul.f32 -1.442695, %v767_v59 }
 0x2c0   : > { %v1272_v62 = vpop.eup %1271  ;;  %1289 = vpow2.f32 %v1051_v58 }
 0x2c1   : > { %v1274_v63 = vpop.eup %1273  ;;  %v848_v0 = vadd.f32 1.0, %v1272_v62  ;;  %1291 = vpow2.f32 %v1054_v60  ;;  %v1192_v1 = vpop.f32.mrb[28].mxu0 }
 0x2c2   : > { %v1276_v2 = vpop.eup %1275  ;;  %v846_v3 = vadd.f32 1.0, %v1274_v63  ;;  %1293 = vpow2.f32 %v1052_v61  ;;  %v788_v4 = vadd.f32 %v1192_v1, %v1546_v17  ;;  %v779_v5 = vpop.f32.mrb[29].mxu0 }
 0x2c3   : > { %v1278_v6 = vpop.eup %1277  ;;  %1295 = vrcp.f32 %v848_v0  ;;  %v849_v7 = vadd.f32 1.0, %v1276_v2  ;;  %v780_v8 = vadd.f32 %v1546_v17, %v779_v5  ;;  %v1193_v9 = vpop.f32.mrb[30].mxu0 }
 0x2c4   : > { %1297 = vrcp.f32 %v846_v3  ;;  %v847_v10 = vadd.f32 1.0, %v1278_v6  ;;  %v1057_v11 = vmul.f32 -1.442695, %v788_v4  ;;  %v791_v12 = vadd.f32 %v1193_v9, %v1546_v17  ;;  %v782_v13 = vpop.f32.mrb[31].mxu0 }
 0x2c5   : > { %v1280_v14 = vpop.eup %1279  ;;  %1299 = vrcp.f32 %v849_v7  ;;  %v1055_v15 = vmul.f32 -1.442695, %v780_v8  ;;  %v783_v16 = vadd.f32 %v1546_v17, %v782_v13 }
 0x2c6   : > { %v1282_v18 = vpop.eup %1281  ;;  %892 = vst [vmem:[%s1567_s27 + $0x10] sm:$0xff] %v1280_v14  ;;  %1301 = vrcp.f32 %v847_v10  ;;  %v1058_v19 = vmul.f32 -1.442695, %v791_v12 }
 0x2c7   : > { %v1284_v20 = vpop.eup %1283  ;;  %890 = vst [vmem:[%s1567_s27] sm:$0xff] %v1282_v18  ;;  %1303 = vpow2.f32 %v1057_v11  ;;  %v1056_v21 = vmul.f32 -1.442695, %v783_v16 }
 0x2c8   : > { %v1286_v22 = vpop.eup %1285  ;;  %893 = vst [vmem:[%s1567_s27 + $0x18] sm:$0xff] %v1284_v20  ;;  %1305 = vpow2.f32 %v1055_v15 }
 0x2c9   : > { %v1288_v23 = vpop.eup %1287  ;;  %891 = vst [vmem:[%s1567_s27 + $0x8] sm:$0xff] %v1286_v22  ;;  %1307 = vpow2.f32 %v1058_v19 }
 0x2ca   : > { %v1290_v17 = vpop.eup %1289  ;;  %v852_v24 = vadd.f32 1.0, %v1288_v23  ;;  %1309 = vpow2.f32 %v1056_v21 }
 0x2cb   : > { %v1292_v25 = vpop.eup %1291  ;;  %v850_v26 = vadd.f32 1.0, %v1290_v17 }
 0x2cc   : > { %v1294_v27 = vpop.eup %1293  ;;  %1311 = vrcp.f32 %v852_v24  ;;  %v853_v28 = vadd.f32 1.0, %v1292_v25 }
 0x2cd   : > { %v1296_v29 = vpop.eup %1295  ;;  %1313 = vrcp.f32 %v850_v26  ;;  %v851_v30 = vadd.f32 1.0, %v1294_v27 }
 0x2ce   : > { %v1298_v31 = vpop.eup %1297  ;;  %896 = vst [vmem:[%s1567_s27 + $0x30] sm:$0xff] %v1296_v29  ;;  %1315 = vrcp.f32 %v853_v28 }
 0x2cf   : > { %v1300_v32 = vpop.eup %1299  ;;  %894 = vst [vmem:[%s1567_s27 + $0x20] sm:$0xff] %v1298_v31  ;;  %1317 = vrcp.f32 %v851_v30 }
 0x2d0   : > { %v1302_v33 = vpop.eup %1301  ;;  %897 = vst [vmem:[%s1567_s27 + $0x38] sm:$0xff] %v1300_v32 }
 0x2d1   : > { %v1304_v34 = vpop.eup %1303  ;;  %895 = vst [vmem:[%s1567_s27 + $0x28] sm:$0xff] %v1302_v33 }
 0x2d2   : > { %v1306_v35 = vpop.eup %1305  ;;  %v856_v36 = vadd.f32 1.0, %v1304_v34 }
 0x2d3   : > { %v1308_v37 = vpop.eup %1307  ;;  %v854_v38 = vadd.f32 1.0, %v1306_v35 }
 0x2d4   : > { %v1310_v39 = vpop.eup %1309  ;;  %1319 = vrcp.f32 %v856_v36  ;;  %v857_v40 = vadd.f32 1.0, %v1308_v37 }
 0x2d5   : > { %1321 = vrcp.f32 %v854_v38  ;;  %v855_v41 = vadd.f32 1.0, %v1310_v39 }
 0x2d6   : > { %v1312_v42 = vpop.eup %1311  ;;  %1323 = vrcp.f32 %v857_v40 }
 0x2d7   : > { %v1314_v43 = vpop.eup %1313  ;;  %900 = vst [vmem:[%s1567_s27 + $0x50] sm:$0xff] %v1312_v42  ;;  %1325 = vrcp.f32 %v855_v41 }
 0x2d8   : > { %v1316_v44 = vpop.eup %1315  ;;  %898 = vst [vmem:[%s1567_s27 + $0x40] sm:$0xff] %v1314_v43 }
 0x2d9   : > { %v1318_v45 = vpop.eup %1317  ;;  %901 = vst [vmem:[%s1567_s27 + $0x58] sm:$0xff] %v1316_v44 }
 0x2da   : > { %899 = vst [vmem:[%s1567_s27 + $0x48] sm:$0xff] %v1318_v45 }
 0x2de   : > { %v1320_v46 = vpop.eup %1319 }
 0x2df   : > { %v1322_v47 = vpop.eup %1321  ;;  %904 = vst [vmem:[%s1567_s27 + $0x70] sm:$0xff] %v1320_v46 }
 0x2e0   : > { %v1324_v48 = vpop.eup %1323  ;;  %902 = vst [vmem:[%s1567_s27 + $0x60] sm:$0xff] %v1322_v47 }
 0x2e1   : > { %v1326_v49 = vpop.eup %1325  ;;  %905 = vst [vmem:[%s1567_s27 + $0x78] sm:$0xff] %v1324_v48 }
 0x2e2   : > { %903 = vst [vmem:[%s1567_s27 + $0x68] sm:$0xff] %v1326_v49 }
 0x2e3   : > { %1340 = shalt.err (!%p1337_p3)
}
 0x2e4   : > { %s1341_s11 = scalar_lea.hbm %s1587_s6, 2048  ;;  %s1345_s14 = scalar_lea.hbm %s1641_s4, 6144 }
 0x2e5   : > { %p1342_p4 = scmp.ne.s32.totalorder %s1587_s6, %s1341_s11  ;;  %p1346_p9 = scmp.lt.u32.totalorder %s1587_s6, %s1641_s4 }
 0x2e6   : > { %p1347_p10 = scmp.lt.u32.totalorder %s1345_s14, %s1341_s11  ;;  %p1349_p12 = scmp.lt.u32.totalorder %s1341_s11, %s1587_s6 }
 0x2e7   : > { %p1343_p7 = pnand %p1342_p4, %p1458_p5 }
 0x2e8   : > { %p1348_p11 = por %p1347_p10, %p1346_p9 }
 0x2e9   : > { %p1344_p8 = pneg %p1343_p7 }
 0x2ea   : > { %p1350_p13 = por %p1349_p12, %p1348_p11 }
 0x2ec   : > { %p1351_p0 = pnand %p1350_p13, %p1344_p8 }
 0x2ee   : > { %1354 = shalt.err (!%p1351_p0)
}
 0x2ef   : > { %s1393_s23 = smov 128   ;;  %s1394_s27 = smov 8  }
 0x2f0   : > { %1194 = dma.vmem_to_hbm [thread:$0]  (%p1458_p5), %s1589_s29, 2048, %s1587_s6, %s1596_s19, %s1393_s23, %s1393_s23, %s1394_s27  }
 0x2f1 PF: > { %p1200_p1 = scmp.ge.s32.totalorder %s1389_s18, 2  ;;  %s935_s28 = sand.u32 1, %s1377_s15  }
 0x2f2   : > { %s936_s30 = scalar_lea.sflag [#allocation3], %s935_s28 }
 0x2f3   : > { %p1197_p2 = pnand %p1200_p1, %p1462_p6 }
 0x2f5   : > { %1372 = dma.done.wait (!%p1197_p2), %s936_s30, 2048  }
 0x2f6   : > { %1374 = vsyncadd (!%p1197_p2), %s936_s30, 4294965248  ;;  %p14_p3 = scmp.ge.s32.totalorder %s1445_s21, 5   ;;  %s1644_s15 = smov %s1381_s16 }
 0x2f7   : > { %s1645_s16 = smov %s1385_s17  ;;  %s1646_s17 = smov %s1456_s24 }
 0x2f8   : > { %s1647_s18 = smov %s1445_s21  ;;  %16 = sbr.rel (!%p14_p3) target bundleno = 3 (0x3), region = 72 }
 0x2ff   :  { %941 = vsyncpa [#allocation3], 1 }
 0x300   :  { %943 = vsyncpa [#allocation3 + $0x1], 1 }

</bundles_post_ra>
